<compile_context>
chip_gen: v5e
topology: v5e:2x2
jax: 0.10.0
libtpu: 0.0.40
codegen_flags: <defaults>
</compile_context>

<pallas_src>
import jax
import jax.numpy as jnp
from jax.experimental import pallas as pl
from jax.experimental.pallas import tpu as pltpu
from dataclasses import dataclass
from functools import partial


@dataclass
class Config:
    d_model: int = 768
    debug: bool = False
    layer_norm_eps: float = 1e-05
    d_vocab: int = 50257
    init_range: float = 0.02
    n_ctx: int = 1024
    d_head: int = 64
    d_mlp: int = 3072
    n_heads: int = 12
    n_layers: int = 12


# gpt2-small basic config (values hard-coded; no checkpoint / network access)
cfg = Config()


def layernorm_kernel(x_ref, w_ref, b_ref, o_ref, *, eps):
    # x_ref: (block_rows, d_model) tile in VMEM; reduction over lanes (last dim).
    # Rows in the partial trailing block may contain garbage, but every row is
    # independent (no cross-row reduction) and OOB writes are discarded.
    x = x_ref[...].astype(jnp.float32)
    mean = jnp.mean(x, axis=-1, keepdims=True)
    xc = x - mean
    var = jnp.mean(xc * xc, axis=-1, keepdims=True)
    inv_scale = jax.lax.rsqrt(var + eps)
    # w/b blocks are resident across the whole grid (index_map always (0,0));
    # cast once per tile, no per-row broadcasts.
    w = w_ref[...].astype(jnp.float32)
    b = b_ref[...].astype(jnp.float32)
    o_ref[...] = (xc * inv_scale * w + b).astype(o_ref.dtype)


def _sublane_multiple(dtype) -> int:
    # Second-to-last block dim must respect sublane packing for the dtype.
    itemsize = jnp.dtype(dtype).itemsize
    return {4: 8, 2: 16, 1: 32}.get(itemsize, 8)


# ~3 MiB input tile: near the measured HBM-roofline sweet spot on v6e and big
# enough to amortize per-step overhead on v7x's faster HBM; trivially fine on v5e.
_TILE_BYTES = 3 * 1024 * 1024
# Keep at least this many grid steps (when the problem allows) so both v7x
# TensorCores get work and each core's pipeline has >=2 steps to overlap.
_MIN_GRID_STEPS = 4


def layer_norm(residual, w, b, *, eps=cfg.layer_norm_eps, tile_bytes=_TILE_BYTES):
    """residual: [batch, position, d_model] -> [batch, position, d_model]."""
    B, S, D = residual.shape
    rows = B * S
    x2d = residual.reshape(rows, D)
    w2d = w.reshape(1, D)
    b2d = b.reshape(1, D)

    itemsize = jnp.dtype(residual.dtype).itemsize
    min_rows = _sublane_multiple(residual.dtype)

    # Constant-byte tile budget: block_rows scales inversely with itemsize
    # (1024 rows for f32, 2048 for bf16, 4096 for 8-bit at D=768).
    target = max(min_rows, (tile_bytes // (D * itemsize)) // min_rows * min_rows)
    # Shrink the block (never below the sublane multiple) so the grid keeps
    # ~_MIN_GRID_STEPS steps when the problem is big enough to split.
    block_for_steps = pl.cdiv(pl.cdiv(rows, _MIN_GRID_STEPS), min_rows) * min_rows
    block = max(min_rows, min(target, block_for_steps))

    # No padding: the trailing block may be partial; Pallas masks OOB writes.
    grid = (pl.cdiv(rows, block),)

    # Right-size the scoped-VMEM cap: double-buffered (in + out) tiles + w/b,
    # plus 50% margin for compiler-internal scratch; clamp to [16, 48] MiB.
    tile_b = block * D * itemsize
    param_b = 2 * D * jnp.dtype(w.dtype).itemsize
    need = 2 * 2 * tile_b + 2 * param_b
    vmem_limit = int(min(max(need + need // 2, 16 * 1024 * 1024),
                         48 * 1024 * 1024))

    out2d = pl.pallas_call(
        partial(layernorm_kernel, eps=eps),
        out_shape=jax.ShapeDtypeStruct((rows, D), residual.dtype),
        grid_spec=pltpu.PrefetchScalarGridSpec(
            num_scalar_prefetch=0,
            grid=grid,
            in_specs=[
                pl.BlockSpec((block, D), lambda i: (i, 0)),
                pl.BlockSpec((1, D), lambda i: (0, 0)),
                pl.BlockSpec((1, D), lambda i: (0, 0)),
            ],
            out_specs=pl.BlockSpec((block, D), lambda i: (i, 0)),
        ),
        compiler_params=pltpu.CompilerParams(
            dimension_semantics=("parallel",),   # shard rows across both TCs on v7x
            vmem_limit_bytes=vmem_limit,
        ),
    )(x2d, w2d, b2d)

    return out2d.reshape(B, S, D)


def layer_norm_ref(residual, w, b, eps=cfg.layer_norm_eps):
    residual = residual - jnp.mean(residual, axis=-1, keepdims=True)
    scale = jnp.sqrt(jnp.mean(residual ** 2, axis=-1, keepdims=True) + eps)
    normalized = residual / scale
    return normalized * w + b


if __name__ == "__main__":
    key = jax.random.PRNGKey(0)
    d_model = cfg.d_model

    # Deterministic parameter init, matching nn.Parameter(torch.ones/zeros(d_model))
    w = jnp.ones((d_model,), dtype=jnp.float32)
    b = jnp.zeros((d_model,), dtype=jnp.float32)

    k1, k2, k3 = jax.random.split(key, 3)

    # Small shape consistent with the module (batch=2, position=8, d_model=768)
    residual = jax.random.normal(k1, (2, 8, d_model), dtype=jnp.float32)
    out = jax.block_until_ready(layer_norm(residual, w, b))
    ref = layer_norm_ref(residual, w, b)
    assert out.shape == residual.shape
    assert jnp.allclose(out, ref, atol=1e-5, rtol=1e-5)

    # rows not a multiple of the sublane block -> partial trailing block path.
    residual2 = jax.random.normal(k2, (2, 9, d_model), dtype=jnp.float32)
    out2 = jax.block_until_ready(layer_norm(residual2, w, b))
    ref2 = layer_norm_ref(residual2, w, b)
    assert out2.shape == residual2.shape
    assert jnp.allclose(out2, ref2, atol=1e-5, rtol=1e-5)

    # Moderate shape: multi-step grid with a partial trailing block, no padding copies.
    residual3 = jax.random.normal(k3, (2, 600, d_model), dtype=jnp.float32)
    out3 = jax.block_until_ready(layer_norm(residual3, w, b))
    ref3 = layer_norm_ref(residual3, w, b)
    assert jnp.allclose(out3, ref3, atol=1e-5, rtol=1e-5)

    # bf16 activations take the constant-byte (larger-row) tile path.
    residual4 = jax.random.normal(k2, (2, 9, d_model), dtype=jnp.bfloat16)
    out4 = jax.block_until_ready(layer_norm(residual4, w, b))
    ref4 = layer_norm_ref(residual4.astype(jnp.float32), w, b)
    assert jnp.allclose(out4.astype(jnp.float32), ref4, atol=5e-2, rtol=0)

    print("KERNEL_OK")
</pallas_src>

<mosaic_0001>
module attributes {stable_mosaic.version = 11 : i64} {
  func.func @layernorm_kernel(%arg0: i32, %arg1: memref<8x768xf32, #tpu.memory_space<vmem>>, %arg2: memref<1x768xf32, #tpu.memory_space<vmem>>, %arg3: memref<1x768xf32, #tpu.memory_space<vmem>>, %arg4: memref<8x768xf32, #tpu.memory_space<vmem>>) attributes {dimension_semantics = [#tpu.dimension_semantics<parallel>], iteration_bounds = array<i64: 2>, scalar_prefetch = 0 : i64, scratch_operands = 0 : i64, tpu.core_type = #tpu.core_type<tc>, window_params = [{transform_indices = @transform_0, window_bounds = array<i64: 8, 768>}, {pipeline_mode = #tpu.pipeline_mode<synchronous>, transform_indices = @transform_1, window_bounds = array<i64: 1, 768>}, {pipeline_mode = #tpu.pipeline_mode<synchronous>, transform_indices = @transform_2, window_bounds = array<i64: 1, 768>}, {transform_indices = @transform_3, window_bounds = array<i64: 8, 768>}]} {
    %c0 = arith.constant 0 : index
    %c0_0 = arith.constant 0 : index
    %0 = vector.load %arg1[%c0, %c0_0] : memref<8x768xf32, #tpu.memory_space<vmem>>, vector<8x768xf32>
    %cst = arith.constant dense<0.000000e+00> : vector<8xf32>
    %1 = vector.multi_reduction <add>, %0, %cst [1] : vector<8x768xf32> to vector<8xf32>
    %2 = vector.shape_cast %1 : vector<8xf32> to vector<8x1xf32>
    %cst_1 = arith.constant 7.680000e+02 : f32
    %3 = vector.broadcast %cst_1 : f32 to vector<8x1xf32>
    %4 = arith.divf %2, %3 : vector<8x1xf32>
    %5 = vector.broadcast %4 : vector<8x1xf32> to vector<8x768xf32>
    %6 = arith.subf %0, %5 : vector<8x768xf32>
    %7 = arith.mulf %6, %6 : vector<8x768xf32>
    %cst_2 = arith.constant dense<0.000000e+00> : vector<8xf32>
    %8 = vector.multi_reduction <add>, %7, %cst_2 [1] : vector<8x768xf32> to vector<8xf32>
    %9 = vector.shape_cast %8 : vector<8xf32> to vector<8x1xf32>
    %cst_3 = arith.constant 7.680000e+02 : f32
    %10 = vector.broadcast %cst_3 : f32 to vector<8x1xf32>
    %11 = arith.divf %9, %10 : vector<8x1xf32>
    %cst_4 = arith.constant 9.99999974E-6 : f32
    %12 = vector.broadcast %cst_4 : f32 to vector<8x1xf32>
    %13 = arith.addf %11, %12 : vector<8x1xf32>
    %14 = math.rsqrt %13 : vector<8x1xf32>
    %c0_5 = arith.constant 0 : index
    %c0_6 = arith.constant 0 : index
    %15 = vector.load %arg2[%c0_5, %c0_6] : memref<1x768xf32, #tpu.memory_space<vmem>>, vector<1x768xf32>
    %c0_7 = arith.constant 0 : index
    %c0_8 = arith.constant 0 : index
    %16 = vector.load %arg3[%c0_7, %c0_8] : memref<1x768xf32, #tpu.memory_space<vmem>>, vector<1x768xf32>
    %17 = vector.broadcast %14 : vector<8x1xf32> to vector<8x768xf32>
    %18 = arith.mulf %6, %17 : vector<8x768xf32>
    %19 = vector.broadcast %15 : vector<1x768xf32> to vector<8x768xf32>
    %20 = arith.mulf %18, %19 : vector<8x768xf32>
    %21 = vector.broadcast %16 : vector<1x768xf32> to vector<8x768xf32>
    %22 = arith.addf %20, %21 : vector<8x768xf32>
    %c0_9 = arith.constant 0 : index
    %c0_10 = arith.constant 0 : index
    %23 = vector.load %arg4[%c0_9, %c0_10] : memref<8x768xf32, #tpu.memory_space<vmem>>, vector<8x768xf32>
    tpu.vector_store %arg4[%c0_9, %c0_10], %22 {strides = array<i32>} : memref<8x768xf32, #tpu.memory_space<vmem>>, vector<8x768xf32>,
    return
  }
  func.func @transform_0(%arg0: i32) -> (i32, i32) {
    %c0_i32 = arith.constant 0 : i32
    %c0_i32_0 = arith.constant 0 : i32
    return %arg0, %c0_i32 : i32, i32
  }
  func.func @transform_1(%arg0: i32) -> (i32, i32) {
    %c0_i32 = arith.constant 0 : i32
    %c0_i32_0 = arith.constant 0 : i32
    %c0_i32_1 = arith.constant 0 : i32
    return %c0_i32, %c0_i32_0 : i32, i32
  }
  func.func @transform_2(%arg0: i32) -> (i32, i32) {
    %c0_i32 = arith.constant 0 : i32
    %c0_i32_0 = arith.constant 0 : i32
    %c0_i32_1 = arith.constant 0 : i32
    return %c0_i32, %c0_i32_0 : i32, i32
  }
  func.func @transform_3(%arg0: i32) -> (i32, i32) {
    %c0_i32 = arith.constant 0 : i32
    %c0_i32_0 = arith.constant 0 : i32
    return %arg0, %c0_i32 : i32, i32
  }
}

</mosaic_0001>

<bundles_post_ra>
// kernel: tpu_custom_call.1
= control target key start
LH: loop header
LB: loop body
LE: loop exit
PB: predicated region body
PF: predicated region fallthrough
CT: control target
= control target key end

     0   :  { %8 = vsyncpa [#allocation3], 0  ;;  %s846_s0 = inlined_call_operand.hbm [shape: f32[16,768], index: 0, kind: input, shape index: {}]   ;;  %s847_s1 = inlined_call_operand.hbm [shape: f32[1,768], index: 1, kind: input, shape index: {}]   ;;  %s848_s2 = inlined_call_operand.hbm [shape: f32[1,768], index: 2, kind: input, shape index: {}]   ;;  %s849_s3 = inlined_call_operand.hbm [shape: f32[16,768], index: 3, kind: output, shape index: {}]  }
   0x1   :  { %10 = vsyncpa [#allocation3 + $0x1], 0 }
   0x2   :  { %11 = vsyncpa [#allocation6], 0 }
   0x3   :  { %12 = vsyncpa [#allocation4], 0 }
   0x4   :  { %14 = vsyncpa [#allocation4 + $0x1], 0  ;;  %s701_s12 = smov 0   ;;  %s703_s13 = smov 0  }
   0x5   :  { %s705_s14 = smov 0   ;;  %s707_s15 = smov 0  }
   0x6 LB: > { %s722_s16 = sadd.s32 4294967295, %s676_s15   ;;  %s428_s17 = sadd.s32 4294967294, %s676_s15   ;;  %s676_s15 = sphi %s707_s15, %s859_s15   ;;  %s672_s14 = sphi %s705_s14, %s858_s14   ;;  %s668_s13 = sphi %s703_s13, %s857_s13   ;;  %s664_s12 = sphi %s701_s12, %s856_s12  }
   0x7   : > { %p40_p0 = scmp.ne.s32.totalorder %s668_s13, %s664_s12  ;;  %p41_p1 = scmp.eq.s32.totalorder %s722_s16, 0 }
   0x8   : > { %p106_p2 = scmp.eq.s32.totalorder %s722_s16, 1  ;;  %p112_p3 = scmp.eq.s32.totalorder %s428_s17, 1 }
   0x9   : > { %p731_p4 = por %p41_p1, %p40_p0  ;;  %p429_p5 = scmp.ge.s32.totalorder %s676_s15, 1 }
   0xa   : > { %p736_p6 = por %p112_p3, %p40_p0  ;;  %p119_p7 = scmp.lt.s32.totalorder %s676_s15, 3 }
   0xb   : > { %s131_s22 = sshll.u32 %s847_s1, 4  ;;  %s678_s24 = smov [#allocation5]   ;;  %s132_s22 = int_to_ptr.hbm [resolvable:$true] %s131_s22 }
   0xc   : > { %p744_p8 = pnand %p429_p5, %p119_p7  ;;  %s133_s25 = sshll.u32 %s678_s24, 4  ;;  %s134_s25 = int_to_ptr.vmem [resolvable:$true] %s133_s25 }
   0xd   : > { %s143_s28 = sshll.u32 %s848_s2, 4  ;;  %s679_s29 = smov [#allocation7]   ;;  %s144_s28 = int_to_ptr.hbm [resolvable:$true] %s143_s28 }
   0xe   : > { %p456_p10 = pneg %p744_p8  ;;  %s145_s30 = sshll.u32 %s679_s29, 4  ;;  %s146_s30 = int_to_ptr.vmem [resolvable:$true] %s145_s30 }
   0xf   : > { %s757_s4 = sadd.s32 1, %s676_s15   ;;  %s27_s5 = sadd.s32 1, %s672_s14 }
  0x10   : > { %p457_p11 = pnand %p456_p10, %p41_p1  ;;  %s24_s6 = ssub.s32 %s676_s15, %s757_s4 }
  0x11   : > { %p34_p12 = scmp.ne.s32.totalorder %s672_s14, %s668_s13  ;;  %p25_p13 = scmp.eq.s32.totalorder %s24_s6, 0 }
  0x12   : > { %459 = dma.hbm_to_vmem [thread:$0]  (!%p457_p11), %s132_s22, 96, %s134_s25, [#allocation6]  }
  0x13   : > { %462 = dma.hbm_to_vmem [thread:$0]  (!%p457_p11), %s144_s28, 96, %s146_s30, [#allocation6]  }
  0x14   : > { %p35_p0 = scmp.eq.s32.totalorder %s676_s15, 0  ;;  %p767_p3 = por %p106_p2, %p34_p12 }
  0x15   : > { %p473_p5 = scmp.lt.s32.totalorder %s676_s15, 2  ;;  %s156_s9 = sand.u32 1, %s672_s14  }
  0x16   : > { %s773_s8 = scalar_select %p25_p13, %s672_s14, %s27_s5  }
  0x17   : > { %p36_p7 = por %p35_p0, %p34_p12  ;;  %s440_s10 = smul.u32 48, %s156_s9 }
  0x18   : > { %s441_s11 = smul.u32 48, %s676_s15  ;;  %s157_s27 = scalar_lea.sflag [#allocation3], %s156_s9 }
  0x19   : > { %p777_p10 = pnand %p473_p5, %p36_p7  ;;  %s160_s24 = scalar_lea.vmem [#allocation2], %s440_s10 }
  0x1a   : > { %s165_s22 = scalar_lea.hbm %s846_s0, %s441_s11  ;;  %s169_s25 = sshll.u32 %s160_s24, 4  ;;  %s170_s25 = int_to_ptr.vmem [resolvable:$true] %s169_s25 }
  0x1b   : > { %s167_s26 = sshll.u32 %s165_s22, 4  ;;  %p580_p11 = pneg %p777_p10  ;;  %s168_s26 = int_to_ptr.hbm [resolvable:$true] %s167_s26 }
  0x1c   : > { %s576_s28 = sshra.s32 %s168_s26, 4  ;;  %s583_s6 = scalar_lea.hbm %s846_s0, 96  ;;  %s577_s28 = int_to_ptr.hbm [resolvable:$true] %s576_s28 }
  0x1d   : > { %s578_s29 = scalar_lea.hbm %s577_s28, 48  ;;  %p584_p0 = scmp.lt.s32.totalorder %s577_s28, %s846_s0 }
  0x1e   : > { %p579_p2 = scmp.ne.s32.totalorder %s577_s28, %s578_s29  ;;  %p585_p5 = scmp.lt.s32.totalorder %s583_s6, %s578_s29 }
  0x20   : > { %p581_p12 = pnand %p580_p11, %p579_p2  ;;  %p586_p7 = por %p585_p5, %p584_p0 }
  0x22   : > { %p582_p13 = pneg %p581_p12 }
  0x24   : > { %p587_p9 = pnand %p586_p7, %p582_p13 }
  0x26   : > { %590 = shalt.err (!%p587_p9)
}
  0x27   : > { %466 = dma.hbm_to_vmem [thread:$0]  (!%p777_p10), %s168_s26, 768, %s170_s25, %s157_s27  }
  0x28   : > { %178 = sbr.rel (%p744_p8) target bundleno = 343 (0x157), region = 32  ;;  %s797_s9 = sand.u32 (!%p744_p8), 1, %s668_s13  }
  0x29   : > { %s442_s10 = smul.u32 (!%p744_p8), 48, %s797_s9  ;;  %s181_s21 = scalar_lea.sflag (!%p744_p8), [#allocation3], %s797_s9 }
  0x2b   : > { %s184_s22 = scalar_lea.vmem (!%p744_p8), [#allocation2], %s442_s10 }
  0x2d   : > { %651 = dma.done.wait (%p731_p4), %s181_s21, 768  }
  0x2e   : > { %653 = vsyncadd (%p731_p4), %s181_s21, 4294966528 }
  0x2f   : > { %655 = dma.done.wait (%p41_p1), [#allocation6], 192  }
  0x30   : > { %657 = vsyncadd (%p41_p1), [#allocation6], 4294967104  ;;  %v218_v0 = vld [vmem:[%s184_s22] sm:$0xff]  ;;  %v219_v1 = vld [vmem:[%s184_s22 + $0x8] sm:$0xff]  ;;  %v680_v11 = vmov 768.0   ;;  %s443_s18 = smul.u32 48, %s722_s16 }
  0x31   : > { %v220_v2 = vld [vmem:[%s184_s22 + $0x10] sm:$0xff]  ;;  %v224_v3 = vadd.f32 %v219_v1, %v218_v0  ;;  %v221_v4 = vld [vmem:[%s184_s22 + $0x18] sm:$0xff]  ;;  %v222_v6 = vld [vmem:[%s184_s22 + $0x20] sm:$0xff]  ;;  %512 = vrcp.f32 %v680_v11  ;;  %s217_s24 = scalar_lea.vmem [#allocation8], %s442_s10  ;;  %s323_s27 = scalar_lea.sflag [#allocation4], %s797_s9 }
  0x32   : > { %v223_v8 = vld [vmem:[%s184_s22 + $0x28] sm:$0xff]  ;;  %v270_v44 = vld [vmem:[#allocation5] sm:$0x3f]  ;;  %s334_s16 = scalar_lea.hbm %s849_s3, %s443_s18  ;;  %s336_s25 = sshll.u32 %s217_s24, 4  ;;  %s337_s25 = int_to_ptr.vmem [resolvable:$true] %s336_s25 }
  0x33   : > { %v225_v5 = vadd.f32 %v224_v3, %v220_v2  ;;  %v271_v46 = vld [vmem:[#allocation7] sm:$0x3f]  ;;  %v279_v47 = vperm.slane %v270_v44, 0  ;;  %v280_v48 = vperm.slane %v270_v44, 1  ;;  %v281_v50 = vperm.slane %v270_v44, 2  ;;  %s338_s26 = sshll.u32 %s334_s16, 4  ;;  %s339_s26 = int_to_ptr.hbm [resolvable:$true] %s338_s26 }
  0x34   : > { %v282_v51 = vperm.slane %v270_v44, 3  ;;  %v283_v52 = vperm.slane %v270_v44, 4  ;;  %v284_v53 = vperm.slane %v270_v44, 5  ;;  %v298_v54 = vperm.slane %v271_v46, 0  ;;  %s620_s28 = sshra.s32 %s339_s26, 4  ;;  %s626_s6 = scalar_lea.hbm %s849_s3, 96  ;;  %s621_s28 = int_to_ptr.hbm [resolvable:$true] %s620_s28 }
  0x35   : > { %v226_v7 = vadd.f32 %v225_v5, %v221_v4  ;;  %v299_v55 = vperm.slane %v271_v46, 1  ;;  %v300_v56 = vperm.slane %v271_v46, 2  ;;  %v301_v62 = vperm.slane %v271_v46, 3  ;;  %s622_s29 = scalar_lea.hbm %s621_s28, 48  ;;  %p627_p9 = scmp.lt.s32.totalorder %s621_s28, %s849_s3 }
  0x36   : > { %v302_v63 = vperm.slane %v271_v46, 4  ;;  %p623_p1 = scmp.ne.s32.totalorder %s621_s28, %s622_s29  ;;  %p628_p10 = scmp.lt.s32.totalorder %s626_s6, %s622_s29 }
  0x37   : > { %v227_v9 = vadd.f32 %v226_v7, %v222_v6  ;;  %v513_v12 = vpop.eup %512 }
  0x38   : > { %v232_v13 = vmul.f32 768.0, %v513_v12  ;;  %vm236_vm0 = vweird.f32 %v513_v12  ;;  %p624_p4 = pnand %p623_p1, %p767_p3  ;;  %p629_p2 = por %p628_p10, %p627_p9 }
  0x39   : > { %v228_v10 = vadd.f32 %v227_v9, %v223_v8 }
  0x3a   : > { %v233_v14 = vsub.f32 1.0, %v232_v13  ;;  %p625_p8 = pneg %p624_p4 }
  0x3b   : > { %229 = vadd.xlane.f32.xlu0 %v228_v10 }
  0x3c   : > { %v234_v15 = vmul.f32 %v513_v12, %v233_v14  ;;  %p630_p11 = pnand %p629_p2, %p625_p8 }
  0x3e   : > { %v235_v16 = vadd.f32 %v513_v12, %v234_v15 }
  0x40   : > { %v237_v17 = vsel %vm236_vm0, %v513_v12, %v235_v16 }
  0xae   : > { %v230_v18 = vpop.xlane.xlu0 %229 }
  0xaf   : > { %v238_v19 = vmul.f32 %v237_v17, %v230_v18 }
  0xb1   : > { %v239_v20 = vsub.f32 %v218_v0, %v238_v19  ;;  %v240_v21 = vsub.f32 %v219_v1, %v238_v19  ;;  %v241_v22 = vsub.f32 %v220_v2, %v238_v19  ;;  %v242_v23 = vsub.f32 %v221_v4, %v238_v19 }
  0xb2   : > { %v243_v26 = vsub.f32 %v222_v6, %v238_v19  ;;  %v244_v29 = vsub.f32 %v223_v8, %v238_v19  ;;  %v303_v6 = vperm.slane %v271_v46, 5 }
  0xb3   : > { %v245_v24 = vmul.f32 %v239_v20, %v239_v20  ;;  %v246_v25 = vmul.f32 %v240_v21, %v240_v21  ;;  %v247_v27 = vmul.f32 %v241_v22, %v241_v22  ;;  %v248_v30 = vmul.f32 %v242_v23, %v242_v23 }
  0xb4   : > { %v249_v32 = vmul.f32 %v243_v26, %v243_v26  ;;  %v250_v34 = vmul.f32 %v244_v29, %v244_v29 }
  0xb5   : > { %v251_v28 = vadd.f32 %v246_v25, %v245_v24 }
  0xb7   : > { %v252_v31 = vadd.f32 %v251_v28, %v247_v27 }
  0xb9   : > { %v253_v33 = vadd.f32 %v252_v31, %v248_v30 }
  0xbb   : > { %v254_v35 = vadd.f32 %v253_v33, %v249_v32 }
  0xbd   : > { %v255_v36 = vadd.f32 %v254_v35, %v250_v34 }
  0xbf   : > { %256 = vadd.xlane.f32.xlu0 %v255_v36 }
 0x132   : > { %v257_v37 = vpop.xlane.xlu0 %256 }
 0x133   : > { %v258_v38 = vmul.f32 %v257_v37, %v237_v17 }
 0x135   : > { %v259_v39 = vadd.f32 1e-05, %v258_v38 }
 0x137   : > { %514 = vrsqrt.f32 %v259_v39  ;;  %vm266_vm2 = vweird.f32 %v259_v39 }
 0x13d   : > { %v515_v40 = vpop.eup %514 }
 0x13e   : > { %v261_v41 = vmul.f32 %v515_v40, %v259_v39  ;;  %vm267_vm1 = vweird.f32 %v515_v40 }
 0x13f   : > { %vm268_vm3 = vmor %vm266_vm2, %vm267_vm1 }
 0x140   : > { %v262_v42 = vmul.f32 %v515_v40, %v261_v41 }
 0x142   : > { %v263_v43 = vmul.f32 0.5, %v262_v42 }
 0x144   : > { %v264_v45 = vsub.f32 1.5, %v263_v43 }
 0x146   : > { %v265_v49 = vmul.f32 %v515_v40, %v264_v45 }
 0x148   : > { %v269_v57 = vsel %vm268_vm3, %v515_v40, %v265_v49 }
 0x149   : > { %v272_v58 = vmul.f32 %v269_v57, %v239_v20  ;;  %v273_v59 = vmul.f32 %v269_v57, %v240_v21  ;;  %v274_v60 = vmul.f32 %v269_v57, %v241_v22  ;;  %v275_v61 = vmul.f32 %v269_v57, %v242_v23 }
 0x14a   : > { %v276_v0 = vmul.f32 %v269_v57, %v243_v26  ;;  %v277_v1 = vmul.f32 %v269_v57, %v244_v29 }
 0x14b   : > { %v291_v2 = vmul.f32 %v279_v47, %v272_v58  ;;  %v292_v3 = vmul.f32 %v280_v48, %v273_v59  ;;  %v293_v4 = vmul.f32 %v281_v50, %v274_v60  ;;  %v294_v5 = vmul.f32 %v282_v51, %v275_v61 }
 0x14c   : > { %v295_v7 = vmul.f32 %v283_v52, %v276_v0  ;;  %v296_v8 = vmul.f32 %v284_v53, %v277_v1 }
 0x14d   : > { %v310_v9 = vadd.f32 %v298_v54, %v291_v2  ;;  %v311_v10 = vadd.f32 %v299_v55, %v292_v3  ;;  %v312_v11 = vadd.f32 %v300_v56, %v293_v4  ;;  %v313_v12 = vadd.f32 %v301_v62, %v294_v5 }
 0x14e   : > { %v314_v13 = vadd.f32 %v302_v63, %v295_v7  ;;  %v315_v14 = vadd.f32 %v303_v6, %v296_v8 }
 0x14f   : > { %316 = vst [vmem:[%s217_s24] sm:$0xff] %v310_v9 }
 0x150   : > { %317 = vst [vmem:[%s217_s24 + $0x8] sm:$0xff] %v311_v10 }
 0x151   : > { %318 = vst [vmem:[%s217_s24 + $0x10] sm:$0xff] %v312_v11 }
 0x152   : > { %319 = vst [vmem:[%s217_s24 + $0x18] sm:$0xff] %v313_v12 }
 0x153   : > { %320 = vst [vmem:[%s217_s24 + $0x20] sm:$0xff] %v314_v13 }
 0x154   : > { %321 = vst [vmem:[%s217_s24 + $0x28] sm:$0xff] %v315_v14 }
 0x155   : > { %633 = shalt.err (!%p630_p11)
}
 0x156   : > { %454 = dma.vmem_to_hbm [thread:$0]  (%p767_p3), %s337_s25, 768, %s339_s26, %s323_s27  }
 0x157 PF: > { %s350_s9 = sand.u32 1, %s664_s12   ;;  %p855_p12 = scmp.ge.s32.totalorder %s676_s15, 2 }
 0x158   : > { %s351_s10 = scalar_lea.sflag [#allocation4], %s350_s9 }
 0x159   : > { %p468_p13 = pnand %p855_p12, %p736_p6 }
 0x15b   : > { %p469_p0 = pneg %p468_p13 }
 0x15d   : > { %659 = dma.done.wait (%p469_p0), %s351_s10, 768  }
 0x15e   : > { %661 = vsyncadd (%p469_p0), %s351_s10, 4294966528  ;;  %p17_p5 = scmp.ge.s32.totalorder %s757_s4, 4   ;;  %s856_s12 = smov %s668_s13 }
 0x15f   : > { %s857_s13 = smov %s672_s14  ;;  %s858_s14 = smov %s773_s8 }
 0x160   : > { %s859_s15 = smov %s757_s4  ;;  %19 = sbr.rel (!%p17_p5) target bundleno = 6 (0x6), region = 85 }
 0x165   :  { %357 = vsyncpa [#allocation3], 1 }
 0x166   :  { %359 = vsyncpa [#allocation3 + $0x1], 1 }
 0x167   :  { %360 = vsyncpa [#allocation6], 1 }
 0x168   :  { %361 = vsyncpa [#allocation4], 1 }
 0x169   :  { %363 = vsyncpa [#allocation4 + $0x1], 1 }

</bundles_post_ra>
